<compile_context>
chip_gen: v7x
topology: tpu7x:2x2x1
jax: 0.10.0
libtpu: 0.0.40
codegen_flags: <defaults>
</compile_context>

<pallas_src>
import functools

import jax
import jax.numpy as jnp
from jax.experimental import pallas as pl
from jax.experimental.pallas import tpu as pltpu


_LANE = 128
# Pipeline-buffer budget: double-buffered (input + output) per grid step.
# Kept under the 32 MiB scoped limit we request below, which is safe on
# v5e/v6e (128 MiB physical) and on v7x (64 MiB physical, 32 MiB default).
_VMEM_PIPELINE_BUDGET = 24 * 1024 * 1024
_VMEM_LIMIT_BYTES = 32 * 1024 * 1024


def _yolo_decode_kernel(pred_ref, gxy_ref, awh_ref, out_ref, *, stride):
    """Decode a block of Bp images.

    pred_ref: (Bp, A, 5+C, GGp) raw network output, native dtype.
    gxy_ref:  (1, 1, 2, GGp)    (grid_x, grid_y) * stride.
    awh_ref:  (1, A, 2, 1)      per-anchor (w, h) in pixels.
    out_ref:  (Bp, A, 5+C, GGp) ch 0..3 decoded boxes (already *stride),
                                ch 4 conf, ch 5.. cls.
    Each output channel is written exactly once; sigmoid/exp (EUP, the binding
    unit) are applied only to the channels that keep them.
    """
    # x, y -> (sigmoid + grid) * stride   (gxy already carries the *stride)
    xy = pred_ref[:, :, 0:2, :].astype(jnp.float32)
    out_ref[:, :, 0:2, :] = jax.nn.sigmoid(xy) * stride + gxy_ref[...]
    # w, h -> exp * anchor_pixels   (tiny awh operand lane/batch-broadcast here)
    wh = pred_ref[:, :, 2:4, :].astype(jnp.float32)
    out_ref[:, :, 2:4, :] = jnp.exp(wh) * awh_ref[...]
    # conf, cls -> sigmoid
    rest = pred_ref[:, :, 4:, :].astype(jnp.float32)
    out_ref[:, :, 4:, :] = jax.nn.sigmoid(rest)


def _choose_images_per_block(batch, per_image_bytes):
    """Largest divisor of `batch` whose double-buffered in+out fits the VMEM
    budget, capped so the parallel grid keeps >= 2 steps (v7x has 2 TCs)."""
    cap = max(1, _VMEM_PIPELINE_BUDGET // max(1, 2 * per_image_bytes))
    if batch >= 2:
        cap = min(cap, batch // 2)
    bp = 1
    for d in range(1, batch + 1):
        if batch % d == 0 and d <= cap:
            bp = d
    return bp


def yolo_layer_forward(x, anchors, num_classes, img_dim):
    """JAX/Pallas equivalent of YoloLayer.forward(x, targets=None, img_dim=...)."""
    B, C, G, G2 = x.shape
    assert G == G2
    A = len(anchors)
    C5 = num_classes + 5
    assert C == A * C5, "channel dim must equal num_anchors * (num_classes + 5)"

    stride = float(img_dim) / float(G)
    GG = G * G
    GGp = ((GG + _LANE - 1) // _LANE) * _LANE   # lane-dense padding (no-op G=16)

    # (B, A*C5, G, G) -> (B, A, C5, GG): free reshape; keep native dtype.
    pred = x.reshape(B, A, C5, GG)
    if GGp != GG:
        pred = jnp.pad(pred, ((0, 0), (0, 0), (0, 0), (0, GGp - GG)))

    # Trace-time decode constants (tiny).
    pos = jnp.arange(GGp, dtype=jnp.int32)
    gx = (pos % G).astype(jnp.float32)
    gy = (pos // G).astype(jnp.float32)
    gxy = (jnp.stack([gx, gy], axis=0) * stride).reshape(1, 1, 2, GGp)

    # Anchor sizes in pixels: torch's exp(w) * (anchor/stride) * stride.
    awh = jnp.asarray(anchors, dtype=jnp.float32).reshape(1, A, 2, 1)

    per_image_bytes = A * C5 * GGp * (x.dtype.itemsize + 4)   # in (native) + out (f32)
    Bp = _choose_images_per_block(B, per_image_bytes)

    kernel = functools.partial(_yolo_decode_kernel, stride=stride)

    out_raw = pl.pallas_call(
        kernel,
        out_shape=jax.ShapeDtypeStruct((B, A, C5, GGp), jnp.float32),
        grid_spec=pltpu.PrefetchScalarGridSpec(
            num_scalar_prefetch=0,
            grid=(B // Bp,),                                   # Bp images / step
            in_specs=[
                pl.BlockSpec((Bp, A, C5, GGp), lambda b: (b, 0, 0, 0)),  # pred
                pl.BlockSpec((1, 1, 2, GGp), lambda b: (0, 0, 0, 0)),    # grid*stride
                pl.BlockSpec((1, A, 2, 1), lambda b: (0, 0, 0, 0)),      # anchors(px)
            ],
            out_specs=pl.BlockSpec((Bp, A, C5, GGp), lambda b: (b, 0, 0, 0)),
        ),
        compiler_params=pltpu.CompilerParams(
            dimension_semantics=("parallel",),                 # megacore on v7x
            vmem_limit_bytes=_VMEM_LIMIT_BYTES),
    )(pred, gxy, awh)

    # (B, A, C5, GGp) -> (B, A*GG, 5+num_classes).
    # NOTE(perf): this XLA transpose round-trips the output through HBM at
    # production shapes; prefer a consumer that accepts the channel-on-sublane
    # layout or fuse the transpose into the downstream op.
    output = out_raw[..., :GG].transpose(0, 1, 3, 2).reshape(B, A * GG, C5)
    # TODO(synk): training branch (build_targets + MSE/BCE losses) not
    # implemented; this mirrors the targets=None path which returns (output, 0).
    return output, 0


def _yolo_ref(x, anchors, num_classes, img_dim):
    """Pure-JAX reference mirroring the PyTorch forward (targets=None)."""
    B, C, G, _ = x.shape
    A = len(anchors)
    C5 = num_classes + 5
    stride = float(img_dim) / float(G)
    pred = x.astype(jnp.float32).reshape(B, A, C5, G, G).transpose(0, 1, 3, 4, 2)
    sx = jax.nn.sigmoid(pred[..., 0])
    sy = jax.nn.sigmoid(pred[..., 1])
    w = pred[..., 2]
    h = pred[..., 3]
    conf = jax.nn.sigmoid(pred[..., 4])
    cls = jax.nn.sigmoid(pred[..., 5:])
    gx = jnp.arange(G, dtype=jnp.float32).reshape(1, 1, 1, G)
    gy = jnp.arange(G, dtype=jnp.float32).reshape(1, 1, G, 1)
    sa = jnp.asarray(anchors, dtype=jnp.float32) / stride
    aw = sa[:, 0].reshape(1, A, 1, 1)
    ah = sa[:, 1].reshape(1, A, 1, 1)
    boxes = jnp.stack(
        [sx + gx, sy + gy, jnp.exp(w) * aw, jnp.exp(h) * ah], axis=-1)
    return jnp.concatenate(
        [boxes.reshape(B, -1, 4) * stride,
         conf.reshape(B, -1, 1),
         cls.reshape(B, -1, num_classes)], axis=-1)


if __name__ == "__main__":
    # Deterministic synthetic configuration (small shapes).
    anchors = [(10.0, 13.0), (16.0, 30.0), (33.0, 23.0)]   # 3 anchors
    num_classes = 4
    img_dim = 64
    B, G = 2, 16
    A = len(anchors)
    C = A * (num_classes + 5)                               # 27 channels

    key = jax.random.PRNGKey(0)
    x = jax.random.normal(key, (B, C, G, G), dtype=jnp.float32)

    out, loss = yolo_layer_forward(x, anchors, num_classes, img_dim)
    out = jax.block_until_ready(out)

    ref = _yolo_ref(x, anchors, num_classes, img_dim)
    assert out.shape == (B, A * G * G, num_classes + 5), out.shape
    assert jnp.allclose(out, ref, atol=1e-5, rtol=1e-5), "mismatch vs reference"
    assert loss == 0

    print("KERNEL_OK")
</pallas_src>

<mosaic_0001>
module attributes {stable_mosaic.version = 11 : i64} {
  func.func @_yolo_decode_kernel(%arg0: i32, %arg1: memref<1x3x9x256xf32, #tpu.memory_space<vmem>>, %arg2: memref<1x1x2x256xf32, #tpu.memory_space<vmem>>, %arg3: memref<1x3x2x1xf32, #tpu.memory_space<vmem>>, %arg4: memref<1x3x9x256xf32, #tpu.memory_space<vmem>>) attributes {dimension_semantics = [#tpu.dimension_semantics<parallel>], iteration_bounds = array<i64: 2>, scalar_prefetch = 0 : i64, scratch_operands = 0 : i64, tpu.core_type = #tpu.core_type<tc>, window_params = [{transform_indices = @transform_0, window_bounds = array<i64: 1, 3, 9, 256>}, {pipeline_mode = #tpu.pipeline_mode<synchronous>, transform_indices = @transform_1, window_bounds = array<i64: 1, 1, 2, 256>}, {pipeline_mode = #tpu.pipeline_mode<synchronous>, transform_indices = @transform_2, window_bounds = array<i64: 1, 3, 2, 1>}, {transform_indices = @transform_3, window_bounds = array<i64: 1, 3, 9, 256>}]} {
    %c0 = arith.constant 0 : index
    %c0_0 = arith.constant 0 : index
    %c0_1 = arith.constant 0 : index
    %c0_2 = arith.constant 0 : index
    %0 = vector.load %arg1[%c0, %c0_0, %c0_1, %c0_2] : memref<1x3x9x256xf32, #tpu.memory_space<vmem>>, vector<1x3x2x256xf32>
    %1 = arith.negf %0 : vector<1x3x2x256xf32>
    %2 = math.exp %1 : vector<1x3x2x256xf32>
    %cst = arith.constant 1.000000e+00 : f32
    %3 = vector.broadcast %cst : f32 to vector<1x3x2x256xf32>
    %4 = arith.addf %3, %2 : vector<1x3x2x256xf32>
    %5 = arith.divf %3, %4 : vector<1x3x2x256xf32>
    %cst_3 = arith.constant 4.000000e+00 : f32
    %6 = vector.broadcast %cst_3 : f32 to vector<1x3x2x256xf32>
    %7 = arith.mulf %5, %6 : vector<1x3x2x256xf32>
    %c0_4 = arith.constant 0 : index
    %c0_5 = arith.constant 0 : index
    %c0_6 = arith.constant 0 : index
    %c0_7 = arith.constant 0 : index
    %8 = vector.load %arg2[%c0_4, %c0_5, %c0_6, %c0_7] : memref<1x1x2x256xf32, #tpu.memory_space<vmem>>, vector<1x1x2x256xf32>
    %9 = vector.broadcast %8 : vector<1x1x2x256xf32> to vector<1x3x2x256xf32>
    %10 = arith.addf %7, %9 : vector<1x3x2x256xf32>
    %c0_8 = arith.constant 0 : index
    %c0_9 = arith.constant 0 : index
    %c0_10 = arith.constant 0 : index
    %c0_11 = arith.constant 0 : index
    %11 = vector.load %arg4[%c0_8, %c0_9, %c0_10, %c0_11] : memref<1x3x9x256xf32, #tpu.memory_space<vmem>>, vector<1x3x2x256xf32>
    tpu.vector_store %arg4[%c0_8, %c0_9, %c0_10, %c0_11], %10 {strides = array<i32>} : memref<1x3x9x256xf32, #tpu.memory_space<vmem>>, vector<1x3x2x256xf32>,
    %c0_12 = arith.constant 0 : index
    %c0_13 = arith.constant 0 : index
    %c2 = arith.constant 2 : index
    %c0_14 = arith.constant 0 : index
    %12 = vector.load %arg1[%c0_12, %c0_13, %c2, %c0_14] : memref<1x3x9x256xf32, #tpu.memory_space<vmem>>, vector<1x3x2x256xf32>
    %13 = math.exp %12 : vector<1x3x2x256xf32>
    %c0_15 = arith.constant 0 : index
    %c0_16 = arith.constant 0 : index
    %c0_17 = arith.constant 0 : index
    %c0_18 = arith.constant 0 : index
    %14 = vector.load %arg3[%c0_15, %c0_16, %c0_17, %c0_18] : memref<1x3x2x1xf32, #tpu.memory_space<vmem>>, vector<1x3x2x1xf32>
    %15 = vector.broadcast %14 : vector<1x3x2x1xf32> to vector<1x3x2x256xf32>
    %16 = arith.mulf %13, %15 : vector<1x3x2x256xf32>
    %c0_19 = arith.constant 0 : index
    %c0_20 = arith.constant 0 : index
    %c2_21 = arith.constant 2 : index
    %c0_22 = arith.constant 0 : index
    %17 = vector.load %arg4[%c0_19, %c0_20, %c2_21, %c0_22] : memref<1x3x9x256xf32, #tpu.memory_space<vmem>>, vector<1x3x2x256xf32>
    tpu.vector_store %arg4[%c0_19, %c0_20, %c2_21, %c0_22], %16 {strides = array<i32>} : memref<1x3x9x256xf32, #tpu.memory_space<vmem>>, vector<1x3x2x256xf32>,
    %c0_23 = arith.constant 0 : index
    %c0_24 = arith.constant 0 : index
    %c4 = arith.constant 4 : index
    %c0_25 = arith.constant 0 : index
    %18 = vector.load %arg1[%c0_23, %c0_24, %c4, %c0_25] : memref<1x3x9x256xf32, #tpu.memory_space<vmem>>, vector<1x3x5x256xf32>
    %19 = arith.negf %18 : vector<1x3x5x256xf32>
    %20 = math.exp %19 : vector<1x3x5x256xf32>
    %cst_26 = arith.constant 1.000000e+00 : f32
    %21 = vector.broadcast %cst_26 : f32 to vector<1x3x5x256xf32>
    %22 = arith.addf %21, %20 : vector<1x3x5x256xf32>
    %23 = arith.divf %21, %22 : vector<1x3x5x256xf32>
    %c0_27 = arith.constant 0 : index
    %c0_28 = arith.constant 0 : index
    %c4_29 = arith.constant 4 : index
    %c0_30 = arith.constant 0 : index
    %24 = vector.load %arg4[%c0_27, %c0_28, %c4_29, %c0_30] : memref<1x3x9x256xf32, #tpu.memory_space<vmem>>, vector<1x3x5x256xf32>
    tpu.vector_store %arg4[%c0_27, %c0_28, %c4_29, %c0_30], %23 {strides = array<i32>} : memref<1x3x9x256xf32, #tpu.memory_space<vmem>>, vector<1x3x5x256xf32>,
    return
  }
  func.func @transform_0(%arg0: i32) -> (i32, i32, i32, i32) {
    %c0_i32 = arith.constant 0 : i32
    %c0_i32_0 = arith.constant 0 : i32
    %c0_i32_1 = arith.constant 0 : i32
    %c0_i32_2 = arith.constant 0 : i32
    return %arg0, %c0_i32, %c0_i32_0, %c0_i32_1 : i32, i32, i32, i32
  }
  func.func @transform_1(%arg0: i32) -> (i32, i32, i32, i32) {
    %c0_i32 = arith.constant 0 : i32
    %c0_i32_0 = arith.constant 0 : i32
    %c0_i32_1 = arith.constant 0 : i32
    %c0_i32_2 = arith.constant 0 : i32
    %c0_i32_3 = arith.constant 0 : i32
    return %c0_i32, %c0_i32_0, %c0_i32_1, %c0_i32_2 : i32, i32, i32, i32
  }
  func.func @transform_2(%arg0: i32) -> (i32, i32, i32, i32) {
    %c0_i32 = arith.constant 0 : i32
    %c0_i32_0 = arith.constant 0 : i32
    %c0_i32_1 = arith.constant 0 : i32
    %c0_i32_2 = arith.constant 0 : i32
    %c0_i32_3 = arith.constant 0 : i32
    return %c0_i32, %c0_i32_0, %c0_i32_1, %c0_i32_2 : i32, i32, i32, i32
  }
  func.func @transform_3(%arg0: i32) -> (i32, i32, i32, i32) {
    %c0_i32 = arith.constant 0 : i32
    %c0_i32_0 = arith.constant 0 : i32
    %c0_i32_1 = arith.constant 0 : i32
    %c0_i32_2 = arith.constant 0 : i32
    return %arg0, %c0_i32, %c0_i32_0, %c0_i32_1 : i32, i32, i32, i32
  }
}

</mosaic_0001>

<bundles_post_ra>
// kernel: tpu_custom_call.1
= control target key start
LH: loop header
LB: loop body
LE: loop exit
PB: predicated region body
PF: predicated region fallthrough
CT: control target
= control target key end

     0   :  { %s598_s12 = smov 0   ;;  %s686_s0 = inlined_call_operand.vmem [shape: f32[2,3,9,256], index: 0, kind: input, shape index: {}]   ;;  %s687_s1 = inlined_call_operand.vmem [shape: f32[1,1,2,256], index: 1, kind: input, shape index: {}]   ;;  %s688_s2 = inlined_call_operand.vmem [shape: f32[1,3,2,1], index: 2, kind: input, shape index: {}]   ;;  %s689_s3 = inlined_call_operand.vmem [shape: f32[2,3,9,256], index: 3, kind: output, shape index: {}]  }
   0x1 LB: > { %s445_s13 = sadd.s32 4294967295, %s575_s12   ;;  %p449_p0 = scmp.ge.s32.totalorder %s575_s12, 1  ;;  %s575_s12 = sphi %s598_s12, %s13_s12  }
   0x2   : > { %p137_p1 = scmp.lt.s32.totalorder %s575_s12, 3 }
   0x4   : > { %p138_p2 = pnand %p449_p0, %p137_p1 }
   0x5   : > { %v261_v0 = vld [vmem:[%s688_s2] sm:$0x3] (!%p138_p2)  ;;  %v263_v1 = vld [vmem:[%s688_s2 + $0x4] sm:$0x3] (!%p138_p2)  ;;  %p161_p3 = scmp.lt.s32.totalorder (!%p138_p2), %s445_s13, 1  ;;  %v577_v2 = vmov (!%p138_p2), 0  }
   0x6   : > { %141 = sbr.rel (%p138_p2) target bundleno = 144 (0x90), region = 32  ;;  %483 = vset.pattern.permute.xlu0 (!%p138_p2), %v577_v2  ;;  %484 = vset.pattern.permute.xlu1 (!%p138_p2), %v577_v2  ;;  %v262_v3 = vld [vmem:[%s688_s2 + $0x2] sm:$0x3] (!%p138_p2) }
   0x7   : > { %266 = vperm.xlu0 (!%p138_p2), %483, %v261_v0   ;;  %274 = vperm.xlu1 (!%p138_p2), %484, %v263_v1   ;;  %v458_v53 = vld.sshfl [vmem:[%s687_s1] sm:$0x33 pattern:$0x76325410] (!%p138_p2) }
   0x8   : > { %v228_v60 = vcombine.high (!%p138_p2), %v458_v53, %v458_v53 }
   0xb   : > { %270 = vperm.xlu0 (!%p138_p2), %483, %v262_v3  }
   0xd   : > { %s691_s13 = smov (!%p161_p3, %s445_s13), 1 }
   0xe   : > { %s473_s20 = smul.u32 96, %s691_s13 }
  0x10   : > { %s623_s23 = scalar_lea.vmem %s686_s0, %s473_s20  ;;  %s651_s28 = scalar_lea.vmem %s689_s3, %s473_s20 }
  0x11   : > { %v171_v4 = vld [vmem:[%s623_s23] sm:$0x3]  ;;  %v172_v5 = vld [vmem:[%s623_s23 + $0x8] sm:$0x3]  ;;  %v294_v16 = vld [vmem:[%s623_s23] sm:$0xf0] }
  0x12   : > { %v173_v6 = vld [vmem:[%s623_s23 + $0x20] sm:$0x3]  ;;  %v174_v7 = vld [vmem:[%s623_s23 + $0x28] sm:$0x3]  ;;  %v452_v10 = vmul.f32 -1.442695, %v171_v4 }
  0x13   : > { %v175_v8 = vld [vmem:[%s623_s23 + $0x40] sm:$0x3]  ;;  %v176_v9 = vld [vmem:[%s623_s23 + $0x48] sm:$0x3]  ;;  %v453_v11 = vmul.f32 -1.442695, %v172_v5 }
  0x14   : > { %v454_v12 = vmul.f32 -1.442695, %v173_v6  ;;  %v455_v13 = vmul.f32 -1.442695, %v174_v7  ;;  %485 = vpow2.f32 %v452_v10  ;;  %v456_v14 = vmul.f32 -1.442695, %v175_v8 }
  0x15   : > { %487 = vpow2.f32 %v453_v11  ;;  %v457_v15 = vmul.f32 -1.442695, %v176_v9  ;;  %v295_v17 = vld [vmem:[%s623_s23 + $0x8] sm:$0xf0]  ;;  %v296_v18 = vld [vmem:[%s623_s23 + $0x10] sm:$0x1] }
  0x16   : > { %489 = vpow2.f32 %v454_v12  ;;  %v297_v19 = vld [vmem:[%s623_s23 + $0x18] sm:$0x1]  ;;  %v298_v20 = vld [vmem:[%s623_s23 + $0x20] sm:$0xf0]  ;;  %v459_v21 = vmul.f32 -1.442695, %v294_v16 }
  0x17   : > { %491 = vpow2.f32 %v455_v13  ;;  %v460_v22 = vmul.f32 -1.442695, %v295_v17  ;;  %v461_v23 = vmul.f32 -1.442695, %v296_v18  ;;  %v462_v24 = vmul.f32 -1.442695, %v297_v19 }
  0x18   : > { %493 = vpow2.f32 %v456_v14  ;;  %v463_v25 = vmul.f32 -1.442695, %v298_v20  ;;  %v299_v31 = vld [vmem:[%s623_s23 + $0x28] sm:$0xf0]  ;;  %v300_v34 = vld [vmem:[%s623_s23 + $0x30] sm:$0x1] }
  0x19   : > { %495 = vpow2.f32 %v457_v15  ;;  %v301_v37 = vld [vmem:[%s623_s23 + $0x38] sm:$0x1]  ;;  %v302_v40 = vld [vmem:[%s623_s23 + $0x40] sm:$0xf0]  ;;  %v464_v41 = vmul.f32 -1.442695, %v299_v31 }
  0x1a   : > { %497 = vpow2.f32 %v459_v21  ;;  %v303_v43 = vld [vmem:[%s623_s23 + $0x48] sm:$0xf0]  ;;  %v465_v44 = vmul.f32 -1.442695, %v300_v34  ;;  %v304_v45 = vld [vmem:[%s623_s23 + $0x50] sm:$0x1] }
  0x1b   : > { %499 = vpow2.f32 %v460_v22  ;;  %v466_v46 = vmul.f32 -1.442695, %v301_v37  ;;  %v305_v48 = vld [vmem:[%s623_s23 + $0x58] sm:$0x1]  ;;  %v467_v49 = vmul.f32 -1.442695, %v302_v40 }
  0x1c   : > { %501 = vpow2.f32 %v461_v23  ;;  %v468_v51 = vmul.f32 -1.442695, %v303_v43  ;;  %v469_v54 = vmul.f32 -1.442695, %v304_v45  ;;  %v470_v56 = vmul.f32 -1.442695, %v305_v48 }
  0x1d   : > { %503 = vpow2.f32 %v462_v24  ;;  %v244_v45 = vld [vmem:[%s623_s23 + $0x8] sm:$0xc] }
  0x1e   : > { %v486_v26 = vpop.eup %485  ;;  %505 = vpow2.f32 %v463_v25  ;;  %v248_v48 = vld [vmem:[%s623_s23 + $0x48] sm:$0xc] }
  0x1f   : > { %v488_v27 = vpop.eup %487  ;;  %v195_v28 = vadd.f32 1.0, %v486_v26 }
  0x20   : > { %v490_v29 = vpop.eup %489  ;;  %v196_v30 = vadd.f32 1.0, %v488_v27 }
  0x21   : > { %v492_v32 = vpop.eup %491  ;;  %v197_v33 = vadd.f32 1.0, %v490_v29  ;;  %507 = vrcp.f32 %v195_v28 }
  0x22   : > { %v494_v35 = vpop.eup %493  ;;  %v198_v36 = vadd.f32 1.0, %v492_v32  ;;  %509 = vrcp.f32 %v196_v30 }
  0x23   : > { %v496_v38 = vpop.eup %495  ;;  %v199_v39 = vadd.f32 1.0, %v494_v35  ;;  %511 = vrcp.f32 %v197_v33 }
  0x24   : > { %v200_v42 = vadd.f32 1.0, %v496_v38  ;;  %513 = vrcp.f32 %v198_v36  ;;  %v498_v47 = vpop.eup %497 }
  0x25   : > { %515 = vrcp.f32 %v199_v39  ;;  %v500_v50 = vpop.eup %499  ;;  %v342_v58 = vadd.f32 1.0, %v498_v47 }
  0x26   : > { %517 = vrcp.f32 %v200_v42  ;;  %v502_v52 = vpop.eup %501  ;;  %v343_v61 = vadd.f32 1.0, %v500_v50 }
  0x27   : > { %519 = vpow2.f32 %v464_v41  ;;  %v504_v55 = vpop.eup %503  ;;  %v344_v0 = vadd.f32 1.0, %v502_v52  ;;  %v245_v52 = vld [vmem:[%s623_s23 + $0x20] sm:$0xc] }
  0x28   : > { %521 = vpow2.f32 %v465_v44  ;;  %v506_v57 = vpop.eup %505  ;;  %v345_v3 = vadd.f32 1.0, %v504_v55  ;;  %v243_v44 = vld [vmem:[%s623_s23] sm:$0xc] }
  0x29   : > { %523 = vpow2.f32 %v466_v46  ;;  %v346_v7 = vadd.f32 1.0, %v506_v57  ;;  %v247_v46 = vld [vmem:[%s623_s23 + $0x40] sm:$0xc]  ;;  %v249_v47 = vmul.f32 1.442695, %v243_v44 }
  0x2a   : > { %525 = vpow2.f32 %v467_v49  ;;  %v251_v49 = vmul.f32 1.442695, %v244_v45  ;;  %v257_v50 = vmul.f32 1.442695, %v247_v46 }
  0x2b   : > { %v508_v59 = vpop.eup %507  ;;  %527 = vpow2.f32 %v468_v51  ;;  %v259_v51 = vmul.f32 1.442695, %v248_v48 }
  0x2c   : > { %v510_v62 = vpop.eup %509  ;;  %v213_v63 = vmul.f32 4.0, %v508_v59  ;;  %529 = vpow2.f32 %v469_v54  ;;  %v253_v54 = vmul.f32 1.442695, %v245_v52 }
  0x2d   : > { %v512_v1 = vpop.eup %511  ;;  %v214_v2 = vmul.f32 4.0, %v510_v62  ;;  %531 = vpow2.f32 %v470_v56 }
  0x2e   : > { %v514_v4 = vpop.eup %513  ;;  %v215_v5 = vmul.f32 4.0, %v512_v1  ;;  %v231_v6 = vadd.f32 %v458_v53, %v213_v63  ;;  %533 = vrcp.f32 %v342_v58 }
  0x2f   : > { %v516_v8 = vpop.eup %515  ;;  %v216_v9 = vmul.f32 4.0, %v514_v4  ;;  %v232_v10 = vadd.f32 %v228_v60, %v214_v2  ;;  %535 = vrcp.f32 %v343_v61 }
  0x30   : > { %v518_v11 = vpop.eup %517  ;;  %v217_v12 = vmul.f32 4.0, %v516_v8  ;;  %v233_v13 = vadd.f32 %v458_v53, %v215_v5  ;;  %237 = vst [vmem:[%s651_s28] sm:$0x3] %v231_v6  ;;  %537 = vrcp.f32 %v344_v0 }
  0x31   : > { %v520_v14 = vpop.eup %519  ;;  %v218_v15 = vmul.f32 4.0, %v518_v11  ;;  %v234_v16 = vadd.f32 %v228_v60, %v216_v9  ;;  %238 = vst [vmem:[%s651_s28 + $0x8] sm:$0x3] %v232_v10  ;;  %539 = vrcp.f32 %v345_v3 }
  0x32   : > { %v522_v17 = vpop.eup %521  ;;  %v235_v18 = vadd.f32 %v458_v53, %v217_v12  ;;  %239 = vst [vmem:[%s651_s28 + $0x20] sm:$0x3] %v233_v13  ;;  %v347_v19 = vadd.f32 1.0, %v520_v14  ;;  %541 = vrcp.f32 %v346_v7  ;;  %v246_v53 = vld [vmem:[%s623_s23 + $0x28] sm:$0xc] }
  0x33   : > { %v524_v20 = vpop.eup %523  ;;  %v236_v21 = vadd.f32 %v228_v60, %v218_v15  ;;  %240 = vst [vmem:[%s651_s28 + $0x28] sm:$0x3] %v234_v16  ;;  %v348_v22 = vadd.f32 1.0, %v522_v17  ;;  %v255_v55 = vmul.f32 1.442695, %v246_v53 }
  0x34   : > { %v526_v23 = vpop.eup %525  ;;  %241 = vst [vmem:[%s651_s28 + $0x40] sm:$0x3] %v235_v18  ;;  %v349_v24 = vadd.f32 1.0, %v524_v20  ;;  %543 = vrcp.f32 %v347_v19 }
  0x35   : > { %v528_v25 = vpop.eup %527  ;;  %242 = vst [vmem:[%s651_s28 + $0x48] sm:$0x3] %v236_v21  ;;  %v350_v26 = vadd.f32 1.0, %v526_v23  ;;  %545 = vrcp.f32 %v348_v22 }
  0x36   : > { %v530_v27 = vpop.eup %529  ;;  %v351_v28 = vadd.f32 1.0, %v528_v25  ;;  %547 = vrcp.f32 %v349_v24 }
  0x37   : > { %v532_v29 = vpop.eup %531  ;;  %v352_v30 = vadd.f32 1.0, %v530_v27  ;;  %549 = vrcp.f32 %v350_v26 }
  0x38   : > { %v534_v31 = vpop.eup %533  ;;  %v353_v32 = vadd.f32 1.0, %v532_v29  ;;  %551 = vrcp.f32 %v351_v28 }
  0x39   : > { %v536_v33 = vpop.eup %535  ;;  %553 = vrcp.f32 %v352_v30  ;;  %378 = vst [vmem:[%s651_s28] sm:$0xf0] %v534_v31 }
  0x3a   : > { %v538_v34 = vpop.eup %537  ;;  %555 = vrcp.f32 %v353_v32  ;;  %379 = vst [vmem:[%s651_s28 + $0x8] sm:$0xf0] %v536_v33 }
  0x3b   : > { %v540_v35 = vpop.eup %539  ;;  %380 = vst [vmem:[%s651_s28 + $0x10] sm:$0x1] %v538_v34  ;;  %557 = vpow2.f32 %v249_v47 }
  0x3c   : > { %v542_v36 = vpop.eup %541  ;;  %381 = vst [vmem:[%s651_s28 + $0x18] sm:$0x1] %v540_v35  ;;  %559 = vpow2.f32 %v251_v49 }
  0x3d   : > { %382 = vst [vmem:[%s651_s28 + $0x20] sm:$0xf0] %v542_v36  ;;  %561 = vpow2.f32 %v257_v50 }
  0x3e   : > { %v544_v37 = vpop.eup %543  ;;  %563 = vpow2.f32 %v259_v51 }
  0x3f   : > { %v546_v38 = vpop.eup %545  ;;  %383 = vst [vmem:[%s651_s28 + $0x28] sm:$0xf0] %v544_v37  ;;  %565 = vpow2.f32 %v253_v54 }
  0x40   : > { %v548_v39 = vpop.eup %547  ;;  %384 = vst [vmem:[%s651_s28 + $0x30] sm:$0x1] %v546_v38  ;;  %567 = vpow2.f32 %v255_v55 }
  0x41   : > { %v550_v40 = vpop.eup %549  ;;  %385 = vst [vmem:[%s651_s28 + $0x38] sm:$0x1] %v548_v39 }
  0x42   : > { %v552_v41 = vpop.eup %551  ;;  %386 = vst [vmem:[%s651_s28 + $0x40] sm:$0xf0] %v550_v40 }
  0x43   : > { %v554_v42 = vpop.eup %553  ;;  %387 = vst [vmem:[%s651_s28 + $0x48] sm:$0xf0] %v552_v41 }
  0x44   : > { %v556_v43 = vpop.eup %555  ;;  %388 = vst [vmem:[%s651_s28 + $0x50] sm:$0x1] %v554_v42 }
  0x45   : > { %389 = vst [vmem:[%s651_s28 + $0x58] sm:$0x1] %v556_v43  ;;  %v558_v56 = vpop.eup %557 }
  0x46   : > { %v560_v57 = vpop.eup %559 }
  0x47   : > { %v562_v58 = vpop.eup %561 }
  0x48   : > { %v564_v59 = vpop.eup %563 }
  0x49   : > { %v566_v0 = vpop.eup %565 }
  0x4a   : > { %v568_v5 = vpop.eup %567 }
  0x86   : > { %v267_v60 = vpop.permute.xlu0 %266  ;;  %v275_v61 = vpop.permute.xlu1 %274 }
  0x87   : > { %v276_v62 = vrot.slane %v267_v60, 6  ;;  %v278_v63 = vrot.slane %v275_v61, 6 }
  0x89   : > { %v282_v1 = vmul.f32 %v558_v56, %v276_v62  ;;  %v283_v2 = vmul.f32 %v560_v57, %v276_v62  ;;  %v286_v3 = vmul.f32 %v562_v58, %v278_v63  ;;  %v287_v4 = vmul.f32 %v564_v59, %v278_v63 }
  0x8a   : > { %v271_v6 = vpop.permute.xlu0 %270 }
  0x8b   : > { %288 = vst [vmem:[%s651_s28] sm:$0xc] %v282_v1  ;;  %289 = vst [vmem:[%s651_s28 + $0x8] sm:$0xc] %v283_v2  ;;  %v277_v7 = vrot.slane %v271_v6, 6 }
  0x8c   : > { %292 = vst [vmem:[%s651_s28 + $0x40] sm:$0xc] %v286_v3  ;;  %293 = vst [vmem:[%s651_s28 + $0x48] sm:$0xc] %v287_v4 }
  0x8d   : > { %v284_v8 = vmul.f32 %v566_v0, %v277_v7  ;;  %v285_v9 = vmul.f32 %v568_v5, %v277_v7 }
  0x8f   : > { %290 = vst [vmem:[%s651_s28 + $0x20] sm:$0xc] %v284_v8  ;;  %291 = vst [vmem:[%s651_s28 + $0x28] sm:$0xc] %v285_v9 }
  0x90 PF: > { %s13_s12 = sadd.s32 1, %s575_s12  }
  0x91   : > { %p10_p4 = scmp.ge.s32.totalorder %s13_s12, 4  }
  0x93   :  { %12 = sbr.rel (!%p10_p4) target bundleno = 1 (0x1), region = 62 }

</bundles_post_ra>
